<compile_context>
chip_gen: v6e
topology: v6e:2x2x1
jax: 0.10.0
libtpu: 0.0.40
codegen_flags: <defaults>
</compile_context>

<pallas_src>
import functools
import math

import jax
import jax.numpy as jnp
from jax.experimental import pallas as pl
from jax.experimental.pallas import tpu as pltpu


def _label_smoothing_kernel(confidence, smooth_val, const_term,
                            inp_ref, tgt_ref, msk_ref, out_ref):
    x = inp_ref[...].astype(jnp.float32)        # (TN, V) log-probabilities
    tgt = tgt_ref[...]                          # (TN, 1) int32 targets
    msk = msk_ref[...].astype(jnp.float32)      # (TN, 1) mask (0 for padding)

    # Smoothed "true" distribution weights: confidence at the target column,
    # smooth_val everywhere else (fill_ + scatter_ in the PyTorch module).
    col = jax.lax.broadcasted_iota(jnp.int32, x.shape, dimension=1)
    w = jnp.where(col == tgt, jnp.float32(confidence), jnp.float32(smooth_val))

    # sum_v td_v * x_v per row: the only data-dependent part of the KL sum.
    tdx = jnp.sum(x * w, axis=-1, keepdims=True)            # (TN, 1)

    # row KL = sum_v td_v*log(td_v) - sum_v td_v*x_v = const_term - tdx
    out_ref[...] = msk * (jnp.float32(const_term) - tdx)


def _pick_tile_n(n_rows, vocab, itemsize, budget_bytes=16 * 1024 * 1024):
    """Largest multiple-of-8 row tile whose double-buffered input fits budget."""
    t = budget_bytes // (2 * vocab * itemsize)
    t = max(8, min(int(t), 1024))
    t -= t % 8
    n8 = ((n_rows + 7) // 8) * 8          # no point tiling wider than the rows
    t = min(t, n8)
    t -= t % 8
    return max(8, t)


def label_smoothing_loss(inp, target, mask, vocab_size, smoothing=0.0, tile_n=None):
    """inp: (B, T, V) log-probs (any float dtype); target: (B, T) int; mask: (B, T)."""
    B, T, V = inp.shape
    target = target[:, :T]
    mask = mask[:, :T]
    N = B * T

    # Keep the activation in its original dtype -> no extra HBM copy / traffic.
    x = inp.reshape(N, V)
    tgt = target.reshape(N, 1).astype(jnp.int32)
    msk = mask.reshape(N, 1).astype(jnp.float32)

    # Host-side scalar constants (replaces per-element log inside the kernel).
    confidence = 1.0 - smoothing
    smooth_val = smoothing / (vocab_size - 1) if vocab_size > 1 else 0.0
    sm_log_sm = smooth_val * math.log(smooth_val) if smooth_val > 0.0 else 0.0
    const_term = confidence * math.log(confidence) + (vocab_size - 1) * sm_log_sm

    itemsize = jnp.dtype(inp.dtype).itemsize
    if tile_n is None:
        tile_n = _pick_tile_n(N, V, itemsize)
    # TODO(synk): for very large vocabularies (V ~ 128K+), add a second
    # "arbitrary" grid axis over V so the row tile can stay large on v7x VMEM.

    grid_n = pl.cdiv(N, tile_n)
    n_pad = grid_n * tile_n
    if n_pad != N:
        pad = n_pad - N
        x = jnp.pad(x, ((0, pad), (0, 0)))
        tgt = jnp.pad(tgt, ((0, pad), (0, 0)))
        msk = jnp.pad(msk, ((0, pad), (0, 0)))   # padded rows -> mask 0

    kernel = functools.partial(_label_smoothing_kernel,
                               confidence, smooth_val, const_term)

    row_kl = pl.pallas_call(
        kernel,
        out_shape=jax.ShapeDtypeStruct((n_pad, 1), jnp.float32),
        grid_spec=pltpu.PrefetchScalarGridSpec(
            num_scalar_prefetch=0,
            grid=(grid_n,),
            in_specs=[
                pl.BlockSpec((tile_n, V), lambda i: (i, 0)),   # log-prob tile
                pl.BlockSpec((tile_n, 1), lambda i: (i, 0)),   # target tile
                pl.BlockSpec((tile_n, 1), lambda i: (i, 0)),   # mask tile
            ],
            out_specs=pl.BlockSpec((tile_n, 1), lambda i: (i, 0)),
        ),
        compiler_params=pltpu.CompilerParams(
            dimension_semantics=("parallel",),        # independent blocks -> megacore-safe
            vmem_limit_bytes=32 * 1024 * 1024),
    )(x, tgt, msk)

    # Final tiny reductions in plain JAX (denominator from the real mask).
    return jnp.sum(row_kl) / jnp.sum(msk)


def _reference_loss(inp, target, mask, vocab_size, smoothing):
    """Pure-JAX replica of the PyTorch forward, for correctness check."""
    B, T, V = inp.shape
    x = inp.reshape(-1, V).astype(jnp.float32)
    t = target.reshape(-1)
    m = mask.reshape(-1).astype(jnp.float32)
    conf = 1.0 - smoothing
    sm = smoothing / (vocab_size - 1)
    td = jnp.full_like(x, sm).at[jnp.arange(x.shape[0]), t].set(conf)
    safe = jnp.where(td > 0.0, td, 1.0)
    kl = jnp.where(td > 0.0, td * (jnp.log(safe) - x), 0.0)
    return (kl.sum(1) * m).sum() / m.sum()


if __name__ == "__main__":
    B, T, V = 2, 8, 32          # batch, sequence length, vocab size
    smoothing = 0.1

    key = jax.random.PRNGKey(0)
    k1, k2, _ = jax.random.split(key, 3)

    logits = jax.random.normal(k1, (B, T, V), dtype=jnp.float32)
    log_probs = jax.nn.log_softmax(logits, axis=-1)           # (B, T, V)
    target = jax.random.randint(k2, (B, T), 0, V, dtype=jnp.int32)
    lengths = jnp.array([6, 4], dtype=jnp.int32)              # valid prefix lengths
    mask = (jnp.arange(T)[None, :] < lengths[:, None]).astype(jnp.float32)

    # f32 path
    loss = jax.block_until_ready(
        label_smoothing_loss(log_probs, target, mask, V, smoothing))
    ref = _reference_loss(log_probs, target, mask, V, smoothing)
    assert jnp.allclose(loss, ref, rtol=1e-5, atol=1e-5), (loss, ref)

    # bf16 path (the intended production dtype: no f32 upcast before the kernel)
    lp_bf16 = log_probs.astype(jnp.bfloat16)
    loss_bf16 = jax.block_until_ready(
        label_smoothing_loss(lp_bf16, target, mask, V, smoothing))
    ref_bf16 = _reference_loss(lp_bf16, target, mask, V, smoothing)
    assert jnp.allclose(loss_bf16, ref_bf16, rtol=1e-4, atol=1e-4), (loss_bf16, ref_bf16)

    print("KERNEL_OK")
</pallas_src>

<mosaic_0001>
module attributes {stable_mosaic.version = 11 : i64} {
  func.func @_label_smoothing_kernel(%arg0: i32, %arg1: memref<16x32xf32, #tpu.memory_space<vmem>>, %arg2: memref<16x1xi32, #tpu.memory_space<vmem>>, %arg3: memref<16x1xf32, #tpu.memory_space<vmem>>, %arg4: memref<16x1xf32, #tpu.memory_space<vmem>>) attributes {dimension_semantics = [#tpu.dimension_semantics<parallel>], iteration_bounds = array<i64: 1>, scalar_prefetch = 0 : i64, scratch_operands = 0 : i64, tpu.core_type = #tpu.core_type<tc>, window_params = [{transform_indices = @transform_0, window_bounds = array<i64: 16, 32>}, {transform_indices = @transform_1, window_bounds = array<i64: 16, 1>}, {transform_indices = @transform_2, window_bounds = array<i64: 16, 1>}, {transform_indices = @transform_3, window_bounds = array<i64: 16, 1>}]} {
    %c0 = arith.constant 0 : index
    %c0_0 = arith.constant 0 : index
    %0 = vector.load %arg1[%c0, %c0_0] : memref<16x32xf32, #tpu.memory_space<vmem>>, vector<16x32xf32>
    %c0_1 = arith.constant 0 : index
    %c0_2 = arith.constant 0 : index
    %1 = vector.load %arg2[%c0_1, %c0_2] : memref<16x1xi32, #tpu.memory_space<vmem>>, vector<16x1xi32>
    %c0_3 = arith.constant 0 : index
    %c0_4 = arith.constant 0 : index
    %2 = vector.load %arg3[%c0_3, %c0_4] : memref<16x1xf32, #tpu.memory_space<vmem>>, vector<16x1xf32>
    %3 = tpu.iota {dimensions = array<i32: 1>} : vector<16x32xi32>
    %4 = vector.broadcast %1 : vector<16x1xi32> to vector<16x32xi32>
    %5 = arith.cmpi eq, %3, %4 : vector<16x32xi32>
    %cst = arith.constant 0.899999976 : f32
    %cst_5 = arith.constant 0.0032258064 : f32
    %6 = vector.broadcast %cst : f32 to vector<16x32xf32>
    %7 = vector.broadcast %cst_5 : f32 to vector<16x32xf32>
    %8 = arith.select %5, %6, %7 : vector<16x32xi1>, vector<16x32xf32>
    %9 = arith.mulf %0, %8 : vector<16x32xf32>
    %cst_6 = arith.constant dense<0.000000e+00> : vector<16xf32>
    %10 = vector.multi_reduction <add>, %9, %cst_6 [1] : vector<16x32xf32> to vector<16xf32>
    %11 = vector.shape_cast %10 : vector<16xf32> to vector<16x1xf32>
    %cst_7 = arith.constant -0.668481708 : f32
    %12 = vector.broadcast %cst_7 : f32 to vector<16x1xf32>
    %13 = arith.subf %12, %11 : vector<16x1xf32>
    %14 = arith.mulf %2, %13 : vector<16x1xf32>
    %c0_8 = arith.constant 0 : index
    %c0_9 = arith.constant 0 : index
    %15 = vector.load %arg4[%c0_8, %c0_9] : memref<16x1xf32, #tpu.memory_space<vmem>>, vector<16x1xf32>
    tpu.vector_store %arg4[%c0_8, %c0_9], %14 {strides = array<i32>} : memref<16x1xf32, #tpu.memory_space<vmem>>, vector<16x1xf32>,
    return
  }
  func.func @transform_0(%arg0: i32) -> (i32, i32) {
    %c0_i32 = arith.constant 0 : i32
    %c0_i32_0 = arith.constant 0 : i32
    return %arg0, %c0_i32 : i32, i32
  }
  func.func @transform_1(%arg0: i32) -> (i32, i32) {
    %c0_i32 = arith.constant 0 : i32
    %c0_i32_0 = arith.constant 0 : i32
    return %arg0, %c0_i32 : i32, i32
  }
  func.func @transform_2(%arg0: i32) -> (i32, i32) {
    %c0_i32 = arith.constant 0 : i32
    %c0_i32_0 = arith.constant 0 : i32
    return %arg0, %c0_i32 : i32, i32
  }
  func.func @transform_3(%arg0: i32) -> (i32, i32) {
    %c0_i32 = arith.constant 0 : i32
    %c0_i32_0 = arith.constant 0 : i32
    return %arg0, %c0_i32 : i32, i32
  }
}

</mosaic_0001>

<bundles_post_ra>
// kernel: tpu_custom_call.1
= control target key start
LH: loop header
LB: loop body
LE: loop exit
PB: predicated region body
PF: predicated region fallthrough
CT: control target
= control target key end

     0   :  { %v55_v0 = vmov 0   ;;  %v20_v3 = vlaneseq  ;;  %v56_v7 = vmov 0.0032258064   ;;  %vm34_vm1 = vcmask 261120   ;;  %s101_s1 = inlined_call_operand.vmem [shape: s32[16,1], index: 1, kind: input, shape index: {}]   ;;  %s102_s0 = inlined_call_operand.vmem [shape: f32[16,32], index: 0, kind: input, shape index: {}]   ;;  %s103_s2 = inlined_call_operand.vmem [shape: f32[16,1], index: 2, kind: input, shape index: {}]   ;;  %s104_s3 = inlined_call_operand.vmem [shape: f32[16,1], index: 3, kind: output, shape index: {}]  }
   0x1   :  { %54 = vset.pattern.permute.xlu0 %v55_v0  ;;  %v16_v1 = vld [vmem:[%s101_s1] sm:$0xff]  ;;  %v17_v2 = vld [vmem:[%s101_s1 + $0x8] sm:$0xff]  ;;  %vm45_vm3 = vcmask 7168  }
   0x2   :  { %23 = vperm.xlu0 %54, %v16_v1   ;;  %v21_v4 = vand.u32 127, %v20_v3  ;;  %v14_v6 = vld [vmem:[%s102_s0] sm:$0xff]  ;;  %v15_v11 = vld [vmem:[%s102_s0 + $0x8] sm:$0xff] }
   0x3   :  { %v18_v16 = vld [vmem:[%s103_s2] sm:$0xff]  ;;  %v19_v20 = vld [vmem:[%s103_s2 + $0x8] sm:$0xff] }
   0x6   :  { %26 = vperm.xlu0 %54, %v17_v2  }
  0x7d   :  { %v24_v5 = vpop.permute.xlu0 %23 }
  0x7e   :  { %vm28_vm0 = vcmp.eq.s32.totalorder %v21_v4, %v24_v5 }
  0x7f   :  { %v30_v8 = vsel %vm28_vm0, 0.9, %v56_v7 }
  0x80   :  { %v32_v9 = vmul.f32 %v30_v8, %v14_v6 }
  0x81   :  { %v27_v10 = vpop.permute.xlu0 %26 }
  0x82   :  { %vm29_vm2 = vcmp.eq.s32.totalorder %v21_v4, %v27_v10  ;;  %v35_v12 = vsel %vm34_vm1, %v32_v9, 0.0 }
  0x83   :  { %v31_v13 = vsel %vm29_vm2, 0.9, %v56_v7  ;;  %36 = vadd.xlane.f32.xlu1 %v35_v12 }
  0x84   :  { %v33_v14 = vmul.f32 %v31_v13, %v15_v11 }
  0x86   :  { %v38_v15 = vsel %vm34_vm1, %v33_v14, 0.0 }
  0x87   :  { %39 = vadd.xlane.f32.xlu1 %v38_v15 }
 0x10c   :  { %v37_v17 = vpop.xlane.xlu1 %36 }
 0x10d   :  { %v41_v18 = vsub.f32 -0.6684817, %v37_v17 }
 0x10f   :  { %v43_v19 = vmul.f32 %v41_v18, %v18_v16 }
 0x110   :  { %v40_v21 = vpop.xlane.xlu1 %39 }
 0x111   :  { %46 = vst.msk [vmem:[%s104_s3] sm:$0xff] %vm45_vm3, %v43_v19  ;;  %v42_v22 = vsub.f32 -0.6684817, %v40_v21 }
 0x113   :  { %v44_v23 = vmul.f32 %v42_v22, %v19_v20 }
 0x115   :  { %47 = vst.msk [vmem:[%s104_s3 + $0x8] sm:$0xff] %vm45_vm3, %v44_v23 }

</bundles_post_ra>
